<compile_context>
chip_gen: v5e
topology: v5e:2x2
jax: 0.10.0
libtpu: 0.0.40
codegen_flags: <defaults>
</compile_context>

<pallas_src>
import functools

import jax
import jax.numpy as jnp
from jax.experimental import pallas as pl
from jax.experimental.pallas import tpu as pltpu


def _value_head_kernel(x_ref, w_ref, b_ref, o_ref):
    # x_ref: (TM, D) VMEM tile of input rows
    # w_ref: (1, D)  VMEM lane-dense weight row
    # b_ref: (1,)    SMEM scalar bias
    # o_ref: (TM, 1) output tile
    x = x_ref[...].astype(jnp.float32)
    w = w_ref[...].astype(jnp.float32)                  # broadcasts over rows
    acc = jnp.sum(x * w, axis=-1, keepdims=True)        # VPU mul + XLU reduce
    o_ref[...] = (acc + b_ref[0]).astype(o_ref.dtype)


def _round_up(v, mult):
    return ((v + mult - 1) // mult) * mult


@functools.partial(jax.jit, static_argnames=("squeeze_value_dim", "block_m"))
def fully_connected_value_head(x, weight, bias, *, squeeze_value_dim=False,
                               block_m=512):
    """x: (..., dim_in); weight: (1, dim_in) (PyTorch layout); bias: (1,)."""
    *lead, dim_in = x.shape
    m = 1
    for d in lead:
        m *= d
    x2d = x.reshape(m, dim_in)

    # Parameters: weight stays lane-dense (1, dim_in); bias is a scalar.
    w_row = weight.reshape(1, dim_in)
    b1 = bias.reshape(1)

    itemsize = x.dtype.itemsize

    # Tile selection: no bigger than the (8-rounded) problem, and keep the
    # double-buffered x tile within a v7x-safe VMEM budget (~32 MiB total).
    bm = min(block_m, _round_up(m, 8))
    max_tile_bytes = 16 * 1024 * 1024  # per buffer; 2x with double buffering
    while bm > 8 and bm * dim_in * itemsize > max_tile_bytes:
        bm //= 2
    bm = max(8, _round_up(bm, 8))

    # Pad the row axis so any M works with the large tile (tail rows masked
    # off by slicing the result afterwards).
    m_pad = _round_up(m, bm)
    if m_pad != m:
        x2d = jnp.pad(x2d, ((0, m_pad - m), (0, 0)))

    grid = (m_pad // bm,)

    # VMEM budget: double-buffered x tile + weight + output tiles + slack.
    vmem_bytes = 2 * bm * dim_in * itemsize + 2 * dim_in * itemsize + (2 << 20)
    vmem_bytes = int(min(max(vmem_bytes, 4 << 20), 100 << 20))

    cost = pl.CostEstimate(
        flops=2 * m_pad * dim_in,
        transcendentals=0,
        bytes_accessed=(m_pad * dim_in * itemsize      # x read
                        + dim_in * itemsize            # weight read
                        + m_pad * itemsize),           # output write
    )

    out2d = pl.pallas_call(
        _value_head_kernel,
        out_shape=jax.ShapeDtypeStruct((m_pad, 1), x.dtype),
        grid=grid,
        in_specs=[
            pl.BlockSpec((bm, dim_in), lambda i: (i, 0)),        # x rows
            pl.BlockSpec((1, dim_in), lambda i: (0, 0)),         # weight row
            pl.BlockSpec(memory_space=pltpu.MemorySpace.SMEM),   # bias scalar
        ],
        out_specs=pl.BlockSpec((bm, 1), lambda i: (i, 0)),
        compiler_params=pltpu.CompilerParams(
            dimension_semantics=("parallel",),
            vmem_limit_bytes=vmem_bytes,
        ),
        cost_estimate=cost,
    )(x2d, w_row, b1)

    out2d = out2d[:m]
    out = out2d.reshape(*lead, 1)
    if squeeze_value_dim:
        out = out.reshape(*lead)
    return out


def _init_params(key, dim_in, dtype=jnp.float32):
    # Deterministic init mimicking nn.Linear's uniform(-1/sqrt(dim_in), ...)
    kw, kb = jax.random.split(key)
    bound = 1.0 / (dim_in ** 0.5)
    weight = jax.random.uniform(kw, (1, dim_in), dtype, -bound, bound)
    bias = jax.random.uniform(kb, (1,), dtype, -bound, bound)
    return weight, bias


if __name__ == "__main__":
    key = jax.random.PRNGKey(0)
    kx, kx2, kp = jax.random.split(key, 3)

    # Small demo shapes consistent with the module.
    batch, seq, dim_in = 2, 8, 32
    x = jax.random.normal(kx, (batch, seq, dim_in), jnp.float32)
    weight, bias = _init_params(kp, dim_in)

    out = fully_connected_value_head(x, weight, bias, squeeze_value_dim=False)
    out_sq = fully_connected_value_head(x, weight, bias, squeeze_value_dim=True)

    # Second case with a row count that is NOT a multiple of the tile size,
    # to exercise the padding path.
    x_odd = jax.random.normal(kx2, (3, 37, dim_in), jnp.float32)
    out_odd = fully_connected_value_head(x_odd, weight, bias)

    jax.block_until_ready((out, out_sq, out_odd))

    # Reference check (plain JAX) to validate semantics.
    ref = x @ weight.T + bias                   # (batch, seq, 1)
    ref_odd = x_odd @ weight.T + bias           # (3, 37, 1)
    assert out.shape == (batch, seq, 1)
    assert out_sq.shape == (batch, seq)
    assert out_odd.shape == (3, 37, 1)
    assert jnp.allclose(out, ref, atol=1e-5)
    assert jnp.allclose(out_sq, ref[..., 0], atol=1e-5)
    assert jnp.allclose(out_odd, ref_odd, atol=1e-5)

    print("KERNEL_OK")
</pallas_src>

<mosaic_0001>
module attributes {stable_mosaic.version = 11 : i64} {
  func.func @_value_head_kernel(%arg0: i32, %arg1: memref<16x32xf32, #tpu.memory_space<vmem>>, %arg2: memref<1x32xf32, #tpu.memory_space<vmem>>, %arg3: memref<1xf32, #tpu.memory_space<smem>>, %arg4: memref<16x1xf32, #tpu.memory_space<vmem>>) attributes {dimension_semantics = [#tpu.dimension_semantics<parallel>], iteration_bounds = array<i64: 1>, scalar_prefetch = 0 : i64, scratch_operands = 0 : i64, tpu.core_type = #tpu.core_type<tc>, window_params = [{transform_indices = @transform_0, window_bounds = array<i64: 16, 32>}, {pipeline_mode = #tpu.pipeline_mode<synchronous>, transform_indices = @transform_1, window_bounds = array<i64: 1, 32>}, {transform_indices = @transform_2, window_bounds = array<i64: 1>}, {transform_indices = @transform_3, window_bounds = array<i64: 16, 1>}]} {
    %c0 = arith.constant 0 : index
    %c0_0 = arith.constant 0 : index
    %0 = vector.load %arg1[%c0, %c0_0] : memref<16x32xf32, #tpu.memory_space<vmem>>, vector<16x32xf32>
    %c0_1 = arith.constant 0 : index
    %c0_2 = arith.constant 0 : index
    %1 = vector.load %arg2[%c0_1, %c0_2] : memref<1x32xf32, #tpu.memory_space<vmem>>, vector<1x32xf32>
    %2 = vector.broadcast %1 : vector<1x32xf32> to vector<16x32xf32>
    %3 = arith.mulf %0, %2 : vector<16x32xf32>
    %cst = arith.constant dense<0.000000e+00> : vector<16xf32>
    %4 = vector.multi_reduction <add>, %3, %cst [1] : vector<16x32xf32> to vector<16xf32>
    %5 = vector.shape_cast %4 : vector<16xf32> to vector<16x1xf32>
    %c0_3 = arith.constant 0 : index
    %6 = memref.load %arg3[%c0_3] : memref<1xf32, #tpu.memory_space<smem>>
    %7 = vector.broadcast %6 : f32 to vector<16x1xf32>
    %8 = arith.addf %5, %7 : vector<16x1xf32>
    %c0_4 = arith.constant 0 : index
    %c0_5 = arith.constant 0 : index
    %9 = vector.load %arg4[%c0_4, %c0_5] : memref<16x1xf32, #tpu.memory_space<vmem>>, vector<16x1xf32>
    tpu.vector_store %arg4[%c0_4, %c0_5], %8 {strides = array<i32>} : memref<16x1xf32, #tpu.memory_space<vmem>>, vector<16x1xf32>,
    return
  }
  func.func @transform_0(%arg0: i32) -> (i32, i32) {
    %c0_i32 = arith.constant 0 : i32
    %c0_i32_0 = arith.constant 0 : i32
    return %arg0, %c0_i32 : i32, i32
  }
  func.func @transform_1(%arg0: i32) -> (i32, i32) {
    %c0_i32 = arith.constant 0 : i32
    %c0_i32_0 = arith.constant 0 : i32
    %c0_i32_1 = arith.constant 0 : i32
    return %c0_i32, %c0_i32_0 : i32, i32
  }
  func.func @transform_2(%arg0: i32) -> i32 {
    %c0_i32 = arith.constant 0 : i32
    %c0_i32_0 = arith.constant 0 : i32
    return %c0_i32 : i32
  }
  func.func @transform_3(%arg0: i32) -> (i32, i32) {
    %c0_i32 = arith.constant 0 : i32
    %c0_i32_0 = arith.constant 0 : i32
    return %arg0, %c0_i32 : i32, i32
  }
}

</mosaic_0001>

<bundles_post_ra>
// kernel: fully_connected_value_head.1
= control target key start
LH: loop header
LB: loop body
LE: loop exit
PB: predicated region body
PF: predicated region fallthrough
CT: control target
= control target key end

     0   :  { %9 = vsyncpa [#allocation4], 0  ;;  %s88_s15 = smov [#allocation3]   ;;  %s89_s17 = smov 128   ;;  %s126_s0 = inlined_call_operand.hbm [shape: f32[16,32], index: 0, kind: input, shape index: {}]   ;;  %s127_s1 = inlined_call_operand.vmem [shape: f32[1,32], index: 1, kind: input, shape index: {}]   ;;  %s128_s2 = inlined_call_operand.<no memory space> [shape: f32[1], index: 2, kind: input, shape index: {}]   ;;  %s129_s3 = inlined_call_operand.vmem [shape: f32[16,1], index: 3, kind: output, shape index: {}]  }
   0x1   :  { %s14_s14 = sshll.u32 %s126_s0, 4  ;;  %s16_s16 = sshll.u32 %s88_s15, 4  ;;  %s15_s14 = int_to_ptr.hbm [resolvable:$true] %s14_s14  ;;  %s17_s16 = int_to_ptr.vmem [resolvable:$true] %s16_s16 }
   0x2   :  { %s90_s18 = smov 8  }
   0x3   :  { %22 = dma.hbm_to_vmem [thread:$0]  %s15_s14, 256, %s17_s16, [#allocation4], %s89_s17, %s89_s17, %s90_s18  }
   0x4   :  { %86 = dma.done.wait [#allocation4], 256  }
   0x5   :  { %87 = vsyncadd [#allocation4], 4294967040  ;;  %v31_v0 = vld [vmem:[#allocation3] sm:$0xff]  ;;  %vm39_vm0 = vcmask 261120   ;;  %v32_v3 = vld [vmem:[#allocation3 + $0x8] sm:$0xff]  ;;  %v47_v7 = vstv %s128_s2  ;;  %vm50_vm1 = vcmask 7168  }
   0x6   :  { %v61_v1 = vld [vmem:[%s127_s1] ss:$0 sm:$0xff] }
   0x7   :  { %v37_v2 = vmul.f32 %v61_v1, %v31_v0  ;;  %v38_v5 = vmul.f32 %v61_v1, %v32_v3 }
   0x9   :  { %v40_v4 = vsel %vm39_vm0, %v37_v2, 0.0  ;;  %v43_v6 = vsel %vm39_vm0, %v38_v5, 0.0 }
   0xa   :  { %41 = vadd.xlane.f32.xlu0 %v40_v4 }
  0x12   :  { %44 = vadd.xlane.f32.xlu0 %v43_v6 }
  0x7d   :  { %v42_v8 = vpop.xlane.xlu0 %41 }
  0x7e   :  { %v48_v9 = vadd.f32 %v47_v7, %v42_v8 }
  0x80   :  { %51 = vst.msk [vmem:[%s129_s3] sm:$0xff] %vm50_vm1, %v48_v9 }
  0x85   :  { %v45_v10 = vpop.xlane.xlu0 %44 }
  0x86   :  { %v49_v11 = vadd.f32 %v47_v7, %v45_v10 }
  0x88   :  { %52 = vst.msk [vmem:[%s129_s3 + $0x8] sm:$0xff] %vm50_vm1, %v49_v11 }
  0x89   :  { %57 = vsyncpa [#allocation4], 1 }

</bundles_post_ra>
